<compile_context>
chip_gen: v5e
topology: v5e:2x2
jax: 0.10.0
libtpu: 0.0.40
codegen_flags: <defaults>
</compile_context>

<pallas_src>
import functools

import jax
import jax.numpy as jnp
from jax.experimental import pallas as pl
from jax.experimental.pallas import tpu as pltpu

EPS = 1e-7
DEFAULT_BLOCK_N = 131072


def _round_up(x, m):
    return (x + m - 1) // m * m


def _f1_stats_kernel(n_ref, yp_ref, lab_ref, tp_out, sp_out, cy_out,
                     tp_acc, sp_acc, cy_acc, *, tiles_per_split, block_n, classes):
    split = pl.program_id(0)        # parallel across TensorCores (v7x)
    it = pl.program_id(1)           # sequential reduction over batch tiles
    n_valid = n_ref[0]
    block_start = (split * tiles_per_split + it) * block_n

    @pl.when(it == 0)
    def _init():
        tp_acc[...] = jnp.zeros_like(tp_acc)
        sp_acc[...] = jnp.zeros_like(sp_acc)
        cy_acc[...] = jnp.zeros_like(cy_acc)

    def _accumulate(mask_cols):
        logits = yp_ref[...].astype(jnp.float32)             # (C, TN)
        labels = lab_ref[...]                                 # (1, TN) int32
        if mask_cols:
            col = jax.lax.broadcasted_iota(jnp.int32, (1, block_n), 1) + block_start
            valid = col < n_valid                             # (1, TN)
            labels = jnp.where(valid, labels, -1)             # kill onehot at padding

        # Row softmax over the class (sublane) axis.
        m = jnp.max(logits, axis=0, keepdims=True)            # (1, TN)
        e = jnp.exp(logits - m)                               # (C, TN) (EUP)
        inv = pl.reciprocal(jnp.sum(e, axis=0, keepdims=True), approx=False)
        p = e * inv                                           # (C, TN)
        if mask_cols:
            # Select (not multiply) so garbage boundary columns cannot inject NaN.
            p = jnp.where(valid, p, 0.0)

        onehot = jax.lax.broadcasted_iota(jnp.int32, (classes, block_n), 0) == labels

        tp_acc[...] += jnp.sum(jnp.where(onehot, p, 0.0), axis=1, keepdims=True)
        sp_acc[...] += jnp.sum(p, axis=1, keepdims=True)                           # tp + fp
        cy_acc[...] += jnp.sum(jnp.where(onehot, 1.0, 0.0), axis=1, keepdims=True)  # tp + fn

    # Only boundary / phantom tiles can contain padded columns.
    needs_mask = block_start + block_n > n_valid

    @pl.when(jnp.logical_not(needs_mask))
    def _fast():
        _accumulate(False)

    @pl.when(needs_mask)
    def _masked():
        _accumulate(True)

    @pl.when(it == tiles_per_split - 1)
    def _write():
        tp_out[0, :, :] = tp_acc[...]
        sp_out[0, :, :] = sp_acc[...]
        cy_out[0, :, :] = cy_acc[...]


@functools.partial(jax.jit, static_argnames=("classes", "epsilon", "block_n", "num_splits"))
def f1_loss_transposed(y_pred_t, y_true, classes=5, epsilon=EPS,
                       block_n=DEFAULT_BLOCK_N, num_splits=2):
    """Soft macro-F1 loss on logits already in the lane-dense (C, N) layout."""
    assert y_pred_t.ndim == 2
    assert y_true.ndim == 1
    c, n = y_pred_t.shape
    assert c == classes
    assert y_true.shape[0] == n

    labels = y_true.astype(jnp.int32).reshape(1, n)           # free reshape

    # Batch-axis (lane) tile size.
    if block_n >= n:
        tn = n
    else:
        tn = min(_round_up(block_n, 128), n)
    total_tiles = pl.cdiv(n, tn)
    splits = max(1, min(num_splits, total_tiles))
    tiles_per_split = pl.cdiv(total_tiles, splits)
    last_block = total_tiles - 1

    def data_map(s, i, n_ref):
        del n_ref
        # Clamp phantom tiles (splits * tiles_per_split > total_tiles) onto the
        # last real block; their columns are fully masked in-kernel.
        return (0, jnp.minimum(s * tiles_per_split + i, last_block))

    kernel = functools.partial(_f1_stats_kernel, tiles_per_split=tiles_per_split,
                               block_n=tn, classes=classes)

    stat_shape = jax.ShapeDtypeStruct((splits, classes, 1), jnp.float32)

    tp_p, sp_p, cy_p = pl.pallas_call(
        kernel,
        out_shape=(stat_shape, stat_shape, stat_shape),
        grid_spec=pltpu.PrefetchScalarGridSpec(
            num_scalar_prefetch=1,
            grid=(splits, tiles_per_split),
            in_specs=[
                pl.BlockSpec((classes, tn), data_map),        # logits tile (C, TN)
                pl.BlockSpec((1, tn), data_map),              # labels tile (1, TN)
            ],
            out_specs=(
                pl.BlockSpec((1, classes, 1), lambda s, i, n_ref: (s, 0, 0)),
                pl.BlockSpec((1, classes, 1), lambda s, i, n_ref: (s, 0, 0)),
                pl.BlockSpec((1, classes, 1), lambda s, i, n_ref: (s, 0, 0)),
            ),
            scratch_shapes=[
                pltpu.VMEM((classes, 1), jnp.float32),        # tp
                pltpu.VMEM((classes, 1), jnp.float32),        # sum_p   (tp + fp)
                pltpu.VMEM((classes, 1), jnp.float32),        # count_y (tp + fn)
            ],
        ),
        compiler_params=pltpu.CompilerParams(
            dimension_semantics=("parallel", "arbitrary"),
            vmem_limit_bytes=40 * 1024 * 1024,
        ),
    )(jnp.array([n], dtype=jnp.int32), y_pred_t, labels)

    # Tiny per-class combine in plain JAX (C elements).
    tp = jnp.sum(tp_p[:, :, 0], axis=0)
    sp = jnp.sum(sp_p[:, :, 0], axis=0)
    cy = jnp.sum(cy_p[:, :, 0], axis=0)
    precision = tp / (sp + epsilon)
    recall = tp / (cy + epsilon)
    f1 = 2.0 * precision * recall / (precision + recall + epsilon)
    f1 = jnp.clip(f1, epsilon, 1.0 - epsilon)
    return 1.0 - jnp.mean(f1)


@functools.partial(jax.jit, static_argnames=("classes", "epsilon", "block_n", "num_splits"))
def f1_loss(y_pred, y_true, classes=5, epsilon=EPS,
            block_n=DEFAULT_BLOCK_N, num_splits=2):
    """Soft macro-F1 loss matching the PyTorch F1Loss module.

    y_pred: (N, C) float logits, y_true: (N,) integer class ids.

    NOTE: the kernel consumes the lane-dense (C, N) layout; this wrapper does
    that relayout once (one extra HBM read+write of the logits).  Callers that
    can produce (C, N) upstream should use `f1_loss_transposed` and skip it.
    """
    assert y_pred.ndim == 2
    assert y_true.ndim == 1
    assert y_pred.shape[1] == classes
    return f1_loss_transposed(jnp.transpose(y_pred), y_true, classes=classes,
                              epsilon=epsilon, block_n=block_n,
                              num_splits=num_splits)


def f1_loss_ref(y_pred, y_true, classes=5, epsilon=EPS):
    """Pure-JAX reference mirroring the PyTorch module."""
    y = jax.nn.one_hot(y_true, classes, dtype=jnp.float32)
    p = jax.nn.softmax(y_pred.astype(jnp.float32), axis=1)
    tp = jnp.sum(y * p, axis=0)
    fp = jnp.sum((1.0 - y) * p, axis=0)
    fn = jnp.sum(y * (1.0 - p), axis=0)
    precision = tp / (tp + fp + epsilon)
    recall = tp / (tp + fn + epsilon)
    f1 = 2.0 * (precision * recall) / (precision + recall + epsilon)
    f1 = jnp.clip(f1, epsilon, 1.0 - epsilon)
    return 1.0 - jnp.mean(f1)


if __name__ == "__main__":
    classes = 5
    key = jax.random.PRNGKey(0)
    k1, k2, k3, k4 = jax.random.split(key, 4)

    # Small shapes consistent with the module's forward: (N, C) logits, (N,) labels.
    batch = 8
    y_pred = jax.random.normal(k1, (batch, classes), dtype=jnp.float32)
    y_true = jax.random.randint(k2, (batch,), 0, classes, dtype=jnp.int32)

    loss = jax.block_until_ready(f1_loss(y_pred, y_true))
    ref = jax.block_until_ready(f1_loss_ref(y_pred, y_true))
    assert jnp.allclose(loss, ref, atol=1e-5, rtol=1e-5), (loss, ref)

    # Exercise multi-tile accumulation, the 2-way split, the ragged boundary
    # tile and a phantom tile (300 samples, 128-lane tiles -> 3 real tiles
    # split 2+2 with one phantom).
    batch2 = 300
    y_pred2 = jax.random.normal(k3, (batch2, classes), dtype=jnp.float32)
    y_true2 = jax.random.randint(k4, (batch2,), 0, classes, dtype=jnp.int32)

    loss2 = jax.block_until_ready(f1_loss(y_pred2, y_true2, block_n=128))
    ref2 = jax.block_until_ready(f1_loss_ref(y_pred2, y_true2))
    assert jnp.allclose(loss2, ref2, atol=1e-5, rtol=1e-5), (loss2, ref2)

    # Lane-dense (C, N) entry point (no wrapper-side relayout).
    loss3 = jax.block_until_ready(
        f1_loss_transposed(jnp.transpose(y_pred2), y_true2, block_n=128))
    assert jnp.allclose(loss3, ref2, atol=1e-5, rtol=1e-5), (loss3, ref2)

    print("KERNEL_OK")
</pallas_src>

<mosaic_0001>
module attributes {stable_mosaic.version = 11 : i64} {
  func.func @_f1_stats_kernel(%arg0: i32, %arg1: i32, %arg2: memref<1xi32, #tpu.memory_space<smem>>, %arg3: memref<5x8xf32, #tpu.memory_space<vmem>>, %arg4: memref<1x8xi32, #tpu.memory_space<vmem>>, %arg5: memref<1x5x1xf32, #tpu.memory_space<vmem>>, %arg6: memref<1x5x1xf32, #tpu.memory_space<vmem>>, %arg7: memref<1x5x1xf32, #tpu.memory_space<vmem>>, %arg8: memref<5x1xf32, #tpu.memory_space<vmem>>, %arg9: memref<5x1xf32, #tpu.memory_space<vmem>>, %arg10: memref<5x1xf32, #tpu.memory_space<vmem>>) attributes {dimension_semantics = [#tpu.dimension_semantics<parallel>, #tpu.dimension_semantics<arbitrary>], iteration_bounds = array<i64: 1, 1>, scalar_prefetch = 1 : i64, scratch_operands = 3 : i64, tpu.core_type = #tpu.core_type<tc>, window_params = [{transform_indices = @transform_0, window_bounds = array<i64: 5, 8>}, {transform_indices = @transform_1, window_bounds = array<i64: 1, 8>}, {transform_indices = @transform_2, window_bounds = array<i64: 1, 5, 1>}, {transform_indices = @transform_3, window_bounds = array<i64: 1, 5, 1>}, {transform_indices = @transform_4, window_bounds = array<i64: 1, 5, 1>}]} {
    %c0 = arith.constant 0 : index
    %0 = memref.load %arg2[%c0] : memref<1xi32, #tpu.memory_space<smem>>
    %c1_i32 = arith.constant 1 : i32
    %1 = arith.muli %arg0, %c1_i32 : i32
    %2 = arith.addi %1, %arg1 : i32
    %c8_i32 = arith.constant 8 : i32
    %3 = arith.muli %2, %c8_i32 : i32
    %c0_i32 = arith.constant 0 : i32
    %4 = arith.cmpi eq, %arg1, %c0_i32 : i32
    %5 = arith.extui %4 : i1 to i32
    %c0_i32_0 = arith.constant 0 : i32
    %6 = arith.cmpi ne, %5, %c0_i32_0 : i32
    scf.if %6 {
      %cst = arith.constant 0.000000e+00 : f32
      %17 = vector.broadcast %cst : f32 to vector<5x1xf32>
      %c0_6 = arith.constant 0 : index
      %c0_7 = arith.constant 0 : index
      %18 = vector.load %arg8[%c0_6, %c0_7] : memref<5x1xf32, #tpu.memory_space<vmem>>, vector<5x1xf32>
      tpu.vector_store %arg8[%c0_6, %c0_7], %17 {strides = array<i32>} : memref<5x1xf32, #tpu.memory_space<vmem>>, vector<5x1xf32>,
      %cst_8 = arith.constant 0.000000e+00 : f32
      %19 = vector.broadcast %cst_8 : f32 to vector<5x1xf32>
      %c0_9 = arith.constant 0 : index
      %c0_10 = arith.constant 0 : index
      %20 = vector.load %arg9[%c0_9, %c0_10] : memref<5x1xf32, #tpu.memory_space<vmem>>, vector<5x1xf32>
      tpu.vector_store %arg9[%c0_9, %c0_10], %19 {strides = array<i32>} : memref<5x1xf32, #tpu.memory_space<vmem>>, vector<5x1xf32>,
      %cst_11 = arith.constant 0.000000e+00 : f32
      %21 = vector.broadcast %cst_11 : f32 to vector<5x1xf32>
      %c0_12 = arith.constant 0 : index
      %c0_13 = arith.constant 0 : index
      %22 = vector.load %arg10[%c0_12, %c0_13] : memref<5x1xf32, #tpu.memory_space<vmem>>, vector<5x1xf32>
      tpu.vector_store %arg10[%c0_12, %c0_13], %21 {strides = array<i32>} : memref<5x1xf32, #tpu.memory_space<vmem>>, vector<5x1xf32>,
    } else {
    }
    %c8_i32_1 = arith.constant 8 : i32
    %7 = arith.addi %3, %c8_i32_1 : i32
    %8 = arith.cmpi sgt, %7, %0 : i32
    %true = arith.constant true
    %9 = arith.xori %8, %true : i1
    %10 = arith.extui %9 : i1 to i32
    %c0_i32_2 = arith.constant 0 : i32
    %11 = arith.cmpi ne, %10, %c0_i32_2 : i32
    scf.if %11 {
      %c0_6 = arith.constant 0 : index
      %c0_7 = arith.constant 0 : index
      %17 = vector.load %arg3[%c0_6, %c0_7] : memref<5x8xf32, #tpu.memory_space<vmem>>, vector<5x8xf32>
      %c0_8 = arith.constant 0 : index
      %c0_9 = arith.constant 0 : index
      %18 = vector.load %arg4[%c0_8, %c0_9] : memref<1x8xi32, #tpu.memory_space<vmem>>, vector<1x8xi32>
      %cst = arith.constant dense<0xFF800000> : vector<8xf32>
      %19 = vector.multi_reduction <maximumf>, %17, %cst [0] : vector<5x8xf32> to vector<8xf32>
      %20 = vector.shape_cast %19 : vector<8xf32> to vector<1x8xf32>
      %21 = vector.broadcast %20 : vector<1x8xf32> to vector<5x8xf32>
      %22 = arith.subf %17, %21 : vector<5x8xf32>
      %23 = math.exp %22 : vector<5x8xf32>
      %cst_10 = arith.constant dense<0.000000e+00> : vector<8xf32>
      %24 = vector.multi_reduction <add>, %23, %cst_10 [0] : vector<5x8xf32> to vector<8xf32>
      %25 = vector.shape_cast %24 : vector<8xf32> to vector<1x8xf32>
      %26 = tpu.reciprocal %25 : vector<1x8xf32> -> vector<1x8xf32>
      %27 = vector.broadcast %26 : vector<1x8xf32> to vector<5x8xf32>
      %28 = arith.mulf %23, %27 : vector<5x8xf32>
      %29 = tpu.iota {dimensions = array<i32: 0>} : vector<5x8xi32>
      %30 = vector.broadcast %18 : vector<1x8xi32> to vector<5x8xi32>
      %31 = arith.cmpi eq, %29, %30 : vector<5x8xi32>
      %c0_11 = arith.constant 0 : index
      %c0_12 = arith.constant 0 : index
      %32 = vector.load %arg8[%c0_11, %c0_12] : memref<5x1xf32, #tpu.memory_space<vmem>>, vector<5x1xf32>
      %cst_13 = arith.constant 0.000000e+00 : f32
      %33 = vector.broadcast %cst_13 : f32 to vector<5x8xf32>
      %34 = arith.select %31, %28, %33 : vector<5x8xi1>, vector<5x8xf32>
      %cst_14 = arith.constant dense<0.000000e+00> : vector<5xf32>
      %35 = vector.multi_reduction <add>, %34, %cst_14 [1] : vector<5x8xf32> to vector<5xf32>
      %36 = vector.shape_cast %35 : vector<5xf32> to vector<5x1xf32>
      %37 = arith.addf %32, %36 : vector<5x1xf32>
      %c0_15 = arith.constant 0 : index
      %c0_16 = arith.constant 0 : index
      %38 = vector.load %arg8[%c0_15, %c0_16] : memref<5x1xf32, #tpu.memory_space<vmem>>, vector<5x1xf32>
      tpu.vector_store %arg8[%c0_15, %c0_16], %37 {strides = array<i32>} : memref<5x1xf32, #tpu.memory_space<vmem>>, vector<5x1xf32>,
      %c0_17 = arith.constant 0 : index
      %c0_18 = arith.constant 0 : index
      %39 = vector.load %arg9[%c0_17, %c0_18] : memref<5x1xf32, #tpu.memory_space<vmem>>, vector<5x1xf32>
      %cst_19 = arith.constant dense<0.000000e+00> : vector<5xf32>
      %40 = vector.multi_reduction <add>, %28, %cst_19 [1] : vector<5x8xf32> to vector<5xf32>
      %41 = vector.shape_cast %40 : vector<5xf32> to vector<5x1xf32>
      %42 = arith.addf %39, %41 : vector<5x1xf32>
      %c0_20 = arith.constant 0 : index
      %c0_21 = arith.constant 0 : index
      %43 = vector.load %arg9[%c0_20, %c0_21] : memref<5x1xf32, #tpu.memory_space<vmem>>, vector<5x1xf32>
      tpu.vector_store %arg9[%c0_20, %c0_21], %42 {strides = array<i32>} : memref<5x1xf32, #tpu.memory_space<vmem>>, vector<5x1xf32>,
      %c0_22 = arith.constant 0 : index
      %c0_23 = arith.constant 0 : index
      %44 = vector.load %arg10[%c0_22, %c0_23] : memref<5x1xf32, #tpu.memory_space<vmem>>, vector<5x1xf32>
      %cst_24 = arith.constant 1.000000e+00 : f32
      %cst_25 = arith.constant 0.000000e+00 : f32
      %45 = vector.broadcast %cst_24 : f32 to vector<5x8xf32>
      %46 = vector.broadcast %cst_25 : f32 to vector<5x8xf32>
      %47 = arith.select %31, %45, %46 : vector<5x8xi1>, vector<5x8xf32>
      %cst_26 = arith.constant dense<0.000000e+00> : vector<5xf32>
      %48 = vector.multi_reduction <add>, %47, %cst_26 [1] : vector<5x8xf32> to vector<5xf32>
      %49 = vector.shape_cast %48 : vector<5xf32> to vector<5x1xf32>
      %50 = arith.addf %44, %49 : vector<5x1xf32>
      %c0_27 = arith.constant 0 : index
      %c0_28 = arith.constant 0 : index
      %51 = vector.load %arg10[%c0_27, %c0_28] : memref<5x1xf32, #tpu.memory_space<vmem>>, vector<5x1xf32>
      tpu.vector_store %arg10[%c0_27, %c0_28], %50 {strides = array<i32>} : memref<5x1xf32, #tpu.memory_space<vmem>>, vector<5x1xf32>,
    } else {
    }
    %12 = arith.extui %8 : i1 to i32
    %c0_i32_3 = arith.constant 0 : i32
    %13 = arith.cmpi ne, %12, %c0_i32_3 : i32
    scf.if %13 {
      %c0_6 = arith.constant 0 : index
      %c0_7 = arith.constant 0 : index
      %17 = vector.load %arg3[%c0_6, %c0_7] : memref<5x8xf32, #tpu.memory_space<vmem>>, vector<5x8xf32>
      %c0_8 = arith.constant 0 : index
      %c0_9 = arith.constant 0 : index
      %18 = vector.load %arg4[%c0_8, %c0_9] : memref<1x8xi32, #tpu.memory_space<vmem>>, vector<1x8xi32>
      %19 = tpu.iota {dimensions = array<i32: 1>} : vector<1x8xi32>
      %20 = vector.broadcast %3 : i32 to vector<1x8xi32>
      %21 = arith.addi %19, %20 : vector<1x8xi32>
      %22 = vector.broadcast %0 : i32 to vector<1x8xi32>
      %23 = arith.cmpi slt, %21, %22 : vector<1x8xi32>
      %c-1_i32 = arith.constant -1 : i32
      %24 = vector.broadcast %c-1_i32 : i32 to vector<1x8xi32>
      %25 = arith.select %23, %18, %24 : vector<1x8xi1>, vector<1x8xi32>
      %cst = arith.constant dense<0xFF800000> : vector<8xf32>
      %26 = vector.multi_reduction <maximumf>, %17, %cst [0] : vector<5x8xf32> to vector<8xf32>
      %27 = vector.shape_cast %26 : vector<8xf32> to vector<1x8xf32>
      %28 = vector.broadcast %27 : vector<1x8xf32> to vector<5x8xf32>
      %29 = arith.subf %17, %28 : vector<5x8xf32>
      %30 = math.exp %29 : vector<5x8xf32>
      %cst_10 = arith.constant dense<0.000000e+00> : vector<8xf32>
      %31 = vector.multi_reduction <add>, %30, %cst_10 [0] : vector<5x8xf32> to vector<8xf32>
      %32 = vector.shape_cast %31 : vector<8xf32> to vector<1x8xf32>
      %33 = tpu.reciprocal %32 : vector<1x8xf32> -> vector<1x8xf32>
      %34 = vector.broadcast %33 : vector<1x8xf32> to vector<5x8xf32>
      %35 = arith.mulf %30, %34 : vector<5x8xf32>
      %cst_11 = arith.constant 0.000000e+00 : f32
      %36 = vector.shape_cast %23 : vector<1x8xi1> to vector<1x8xi1>
      %37 = vector.broadcast %36 : vector<1x8xi1> to vector<5x8xi1>
      %38 = vector.broadcast %cst_11 : f32 to vector<5x8xf32>
      %39 = arith.select %37, %35, %38 : vector<5x8xi1>, vector<5x8xf32>
      %40 = tpu.iota {dimensions = array<i32: 0>} : vector<5x8xi32>
      %41 = vector.broadcast %25 : vector<1x8xi32> to vector<5x8xi32>
      %42 = arith.cmpi eq, %40, %41 : vector<5x8xi32>
      %c0_12 = arith.constant 0 : index
      %c0_13 = arith.constant 0 : index
      %43 = vector.load %arg8[%c0_12, %c0_13] : memref<5x1xf32, #tpu.memory_space<vmem>>, vector<5x1xf32>
      %cst_14 = arith.constant 0.000000e+00 : f32
      %44 = vector.broadcast %cst_14 : f32 to vector<5x8xf32>
      %45 = arith.select %42, %39, %44 : vector<5x8xi1>, vector<5x8xf32>
      %cst_15 = arith.constant dense<0.000000e+00> : vector<5xf32>
      %46 = vector.multi_reduction <add>, %45, %cst_15 [1] : vector<5x8xf32> to vector<5xf32>
      %47 = vector.shape_cast %46 : vector<5xf32> to vector<5x1xf32>
      %48 = arith.addf %43, %47 : vector<5x1xf32>
      %c0_16 = arith.constant 0 : index
      %c0_17 = arith.constant 0 : index
      %49 = vector.load %arg8[%c0_16, %c0_17] : memref<5x1xf32, #tpu.memory_space<vmem>>, vector<5x1xf32>
      tpu.vector_store %arg8[%c0_16, %c0_17], %48 {strides = array<i32>} : memref<5x1xf32, #tpu.memory_space<vmem>>, vector<5x1xf32>,
      %c0_18 = arith.constant 0 : index
      %c0_19 = arith.constant 0 : index
      %50 = vector.load %arg9[%c0_18, %c0_19] : memref<5x1xf32, #tpu.memory_space<vmem>>, vector<5x1xf32>
      %cst_20 = arith.constant dense<0.000000e+00> : vector<5xf32>
      %51 = vector.multi_reduction <add>, %39, %cst_20 [1] : vector<5x8xf32> to vector<5xf32>
      %52 = vector.shape_cast %51 : vector<5xf32> to vector<5x1xf32>
      %53 = arith.addf %50, %52 : vector<5x1xf32>
      %c0_21 = arith.constant 0 : index
      %c0_22 = arith.constant 0 : index
      %54 = vector.load %arg9[%c0_21, %c0_22] : memref<5x1xf32, #tpu.memory_space<vmem>>, vector<5x1xf32>
      tpu.vector_store %arg9[%c0_21, %c0_22], %53 {strides = array<i32>} : memref<5x1xf32, #tpu.memory_space<vmem>>, vector<5x1xf32>,
      %c0_23 = arith.constant 0 : index
      %c0_24 = arith.constant 0 : index
      %55 = vector.load %arg10[%c0_23, %c0_24] : memref<5x1xf32, #tpu.memory_space<vmem>>, vector<5x1xf32>
      %cst_25 = arith.constant 1.000000e+00 : f32
      %cst_26 = arith.constant 0.000000e+00 : f32
      %56 = vector.broadcast %cst_25 : f32 to vector<5x8xf32>
      %57 = vector.broadcast %cst_26 : f32 to vector<5x8xf32>
      %58 = arith.select %42, %56, %57 : vector<5x8xi1>, vector<5x8xf32>
      %cst_27 = arith.constant dense<0.000000e+00> : vector<5xf32>
      %59 = vector.multi_reduction <add>, %58, %cst_27 [1] : vector<5x8xf32> to vector<5xf32>
      %60 = vector.shape_cast %59 : vector<5xf32> to vector<5x1xf32>
      %61 = arith.addf %55, %60 : vector<5x1xf32>
      %c0_28 = arith.constant 0 : index
      %c0_29 = arith.constant 0 : index
      %62 = vector.load %arg10[%c0_28, %c0_29] : memref<5x1xf32, #tpu.memory_space<vmem>>, vector<5x1xf32>
      tpu.vector_store %arg10[%c0_28, %c0_29], %61 {strides = array<i32>} : memref<5x1xf32, #tpu.memory_space<vmem>>, vector<5x1xf32>,
    } else {
    }
    %c0_i32_4 = arith.constant 0 : i32
    %14 = arith.cmpi eq, %arg1, %c0_i32_4 : i32
    %15 = arith.extui %14 : i1 to i32
    %c0_i32_5 = arith.constant 0 : i32
    %16 = arith.cmpi ne, %15, %c0_i32_5 : i32
    scf.if %16 {
      %c0_6 = arith.constant 0 : index
      %c0_7 = arith.constant 0 : index
      %17 = vector.load %arg8[%c0_6, %c0_7] : memref<5x1xf32, #tpu.memory_space<vmem>>, vector<5x1xf32>
      %c0_8 = arith.constant 0 : index
      %c0_9 = arith.constant 0 : index
      %c0_10 = arith.constant 0 : index
      %18 = vector.load %arg5[%c0_8, %c0_9, %c0_10] : memref<1x5x1xf32, #tpu.memory_space<vmem>>, vector<1x5x1xf32>
      %19 = vector.shape_cast %18 : vector<1x5x1xf32> to vector<5x1xf32>
      %20 = vector.shape_cast %17 : vector<5x1xf32> to vector<1x5x1xf32>
      tpu.vector_store %arg5[%c0_8, %c0_9, %c0_10], %20 {strides = array<i32>} : memref<1x5x1xf32, #tpu.memory_space<vmem>>, vector<1x5x1xf32>,
      %c0_11 = arith.constant 0 : index
      %c0_12 = arith.constant 0 : index
      %21 = vector.load %arg9[%c0_11, %c0_12] : memref<5x1xf32, #tpu.memory_space<vmem>>, vector<5x1xf32>
      %c0_13 = arith.constant 0 : index
      %c0_14 = arith.constant 0 : index
      %c0_15 = arith.constant 0 : index
      %22 = vector.load %arg6[%c0_13, %c0_14, %c0_15] : memref<1x5x1xf32, #tpu.memory_space<vmem>>, vector<1x5x1xf32>
      %23 = vector.shape_cast %22 : vector<1x5x1xf32> to vector<5x1xf32>
      %24 = vector.shape_cast %21 : vector<5x1xf32> to vector<1x5x1xf32>
      tpu.vector_store %arg6[%c0_13, %c0_14, %c0_15], %24 {strides = array<i32>} : memref<1x5x1xf32, #tpu.memory_space<vmem>>, vector<1x5x1xf32>,
      %c0_16 = arith.constant 0 : index
      %c0_17 = arith.constant 0 : index
      %25 = vector.load %arg10[%c0_16, %c0_17] : memref<5x1xf32, #tpu.memory_space<vmem>>, vector<5x1xf32>
      %c0_18 = arith.constant 0 : index
      %c0_19 = arith.constant 0 : index
      %c0_20 = arith.constant 0 : index
      %26 = vector.load %arg7[%c0_18, %c0_19, %c0_20] : memref<1x5x1xf32, #tpu.memory_space<vmem>>, vector<1x5x1xf32>
      %27 = vector.shape_cast %26 : vector<1x5x1xf32> to vector<5x1xf32>
      %28 = vector.shape_cast %25 : vector<5x1xf32> to vector<1x5x1xf32>
      tpu.vector_store %arg7[%c0_18, %c0_19, %c0_20], %28 {strides = array<i32>} : memref<1x5x1xf32, #tpu.memory_space<vmem>>, vector<1x5x1xf32>,
    } else {
    }
    return
  }
  func.func @transform_0(%arg0: i32, %arg1: i32, %arg2: memref<1xi32, #tpu.memory_space<smem>>) -> (i32, i32) {
    %c1_i32 = arith.constant 1 : i32
    %0 = arith.muli %arg0, %c1_i32 : i32
    %1 = arith.addi %0, %arg1 : i32
    %c0_i32 = arith.constant 0 : i32
    %2 = arith.minsi %1, %c0_i32 : i32
    %c0_i32_0 = arith.constant 0 : i32
    %c0_i32_1 = arith.constant 0 : i32
    return %c0_i32_0, %2 : i32, i32
  }
  func.func @transform_1(%arg0: i32, %arg1: i32, %arg2: memref<1xi32, #tpu.memory_space<smem>>) -> (i32, i32) {
    %c1_i32 = arith.constant 1 : i32
    %0 = arith.muli %arg0, %c1_i32 : i32
    %1 = arith.addi %0, %arg1 : i32
    %c0_i32 = arith.constant 0 : i32
    %2 = arith.minsi %1, %c0_i32 : i32
    %c0_i32_0 = arith.constant 0 : i32
    %c0_i32_1 = arith.constant 0 : i32
    return %c0_i32_0, %2 : i32, i32
  }
  func.func @transform_2(%arg0: i32, %arg1: i32, %arg2: memref<1xi32, #tpu.memory_space<smem>>) -> (i32, i32, i32) {
    %c0_i32 = arith.constant 0 : i32
    %c0_i32_0 = arith.constant 0 : i32
    %c0_i32_1 = arith.constant 0 : i32
    return %arg0, %c0_i32, %c0_i32_0 : i32, i32, i32
  }
  func.func @transform_3(%arg0: i32, %arg1: i32, %arg2: memref<1xi32, #tpu.memory_space<smem>>) -> (i32, i32, i32) {
    %c0_i32 = arith.constant 0 : i32
    %c0_i32_0 = arith.constant 0 : i32
    %c0_i32_1 = arith.constant 0 : i32
    return %arg0, %c0_i32, %c0_i32_0 : i32, i32, i32
  }
  func.func @transform_4(%arg0: i32, %arg1: i32, %arg2: memref<1xi32, #tpu.memory_space<smem>>) -> (i32, i32, i32) {
    %c0_i32 = arith.constant 0 : i32
    %c0_i32_0 = arith.constant 0 : i32
    %c0_i32_1 = arith.constant 0 : i32
    return %arg0, %c0_i32, %c0_i32_0 : i32, i32, i32
  }
}

</mosaic_0001>

<bundles_post_ra>
// kernel: f1_loss_transposed.1
= control target key start
LH: loop header
LB: loop body
LE: loop exit
PB: predicated region body
PF: predicated region fallthrough
CT: control target
= control target key end

     0   :  { %12 = vsyncpa [#allocation8], 0  ;;  %s283_s21 = smov [#allocation7]   ;;  %s378_s0 = inlined_call_operand.<no memory space> [shape: s32[1], index: 0, kind: input, shape index: {}]   ;;  %s379_s1 = inlined_call_operand.hbm [shape: f32[5,8], index: 1, kind: input, shape index: {}]   ;;  %s380_s2 = inlined_call_operand.vmem [shape: s32[1,8], index: 2, kind: input, shape index: {}]   ;;  %s381_s3 = inlined_call_operand.vmem [shape: f32[1,5,1], index: 3, kind: output, shape index: {0}]   ;;  %s382_s4 = inlined_call_operand.vmem [shape: f32[1,5,1], index: 4, kind: output, shape index: {1}]   ;;  %s383_s5 = inlined_call_operand.vmem [shape: f32[1,5,1], index: 5, kind: output, shape index: {2}]  }
   0x1   :  { %s23_s20 = sshll.u32 %s379_s1, 4  ;;  %s25_s22 = sshll.u32 %s283_s21, 4  ;;  %s24_s20 = int_to_ptr.hbm [resolvable:$true] %s23_s20  ;;  %s26_s22 = int_to_ptr.vmem [resolvable:$true] %s25_s22 }
   0x2   :  { %28 = dma.hbm_to_vmem [thread:$0]  %s24_s20, 128, %s26_s22, [#allocation8]  }
   0x3   :  { %281 = dma.done.wait [#allocation8], 128  }
   0x4   :  { %282 = vsyncadd [#allocation8], 4294967168  ;;  %vm69_vm0 = vcmask 4096   ;;  %v284_v0 = vmov 0.0   ;;  %p242_p0 = scmp.lt.s32.totalorder %s378_s0, 8 }
   0x5   :  { %70 = vst.msk [vmem:[#allocation2] sm:$0x1f] %vm69_vm0, %v284_v0 }
   0x6   :  { %71 = vst.msk [vmem:[#allocation3] sm:$0x1f] %vm69_vm0, %v284_v0  ;;  %78 = sbr.rel (%p242_p0) target bundleno = 197 (0xc5), region = 21 }
   0x7   :  { %72 = vst.msk [vmem:[#allocation4] sm:$0x1f] %vm69_vm0, %v284_v0 }
   0xb   :  { %v79_v1 = vld [vmem:[#allocation7] sm:$0x1f]  ;;  %vm81_vm1 = vcmask 61440   ;;  %v114_v11 = vlaneseq  ;;  %v248_v13 = vld [vmem:[%s380_s2] ss:$0 sm:$0xff]  ;;  %v285_v18 = vmov 0.0  }
   0xc   :  { %v82_v2 = vsel %vm81_vm1, %v79_v1, -inf  ;;  %v118_v42 = vld [vmem:[#allocation2] sm:$0x1f] }
   0xd   :  { %v83_v3 = vrot.slane %v82_v2, 4  ;;  %v115_v12 = vshrl.u32 %v114_v11, 7  ;;  %v126_v45 = vld [vmem:[#allocation3] sm:$0x1f] }
   0xe   :  { %v132_v39 = vld [vmem:[#allocation4] sm:$0x1f] }
   0xf   :  { %v84_v4 = vmax.f32 %v82_v2, %v83_v3  ;;  %vm117_vm2 = vcmp.eq.s32.totalorder %v115_v12, %v248_v13 }
  0x10   :  { %v133_v19 = vsel %vm117_vm2, 1.0, %v285_v18 }
  0x11   :  { %v85_v5 = vrot.slane %v84_v4, 2  ;;  %v134_v20 = vsel %vm81_vm1, %v133_v19, 0.0 }
  0x12   :  { %135 = vadd.xlane.f32.xlu1 %v134_v20 }
  0x13   :  { %v86_v6 = vmax.f32 %v84_v4, %v85_v5 }
  0x15   :  { %v87_v7 = vrot.slane %v86_v6, 1 }
  0x17   :  { %v88_v8 = vmax.f32 %v86_v6, %v87_v7 }
  0x19   :  { %v89_v9 = vsub.f32 %v79_v1, %v88_v8 }
  0x1b   :  { %v90_v10 = vmul.f32 1.442695, %v89_v9 }
  0x1d   :  { %249 = vpow2.f32 %v90_v10 }
  0x23   :  { %v250_v14 = vpop.eup %249 }
  0x24   :  { %v92_v15 = vsel %vm81_vm1, %v250_v14, 0.0 }
  0x25   :  { %v93_v16 = vrot.slane %v92_v15, 4 }
  0x27   :  { %v94_v17 = vadd.f32 %v93_v16, %v92_v15 }
  0x29   :  { %v95_v21 = vrot.slane %v94_v17, 2 }
  0x2b   :  { %v96_v22 = vadd.f32 %v95_v21, %v94_v17 }
  0x2d   :  { %v97_v23 = vrot.slane %v96_v22, 1 }
  0x2f   :  { %v98_v24 = vadd.f32 %v97_v23, %v96_v22 }
  0x31   :  { %251 = vrcp.f32 %v98_v24  ;;  %v110_v27 = vand.u32 2147483648, %v98_v24  ;;  %vm104_vm3 = vweird.f32 %v98_v24  ;;  %v108_v29 = vand.u32 2147483647, %v98_v24 }
  0x33   :  { %v111_v31 = vor.u32 1.1754944e-38, %v110_v27  ;;  %vm109_vm6 = vcmp.eq.f32.partialorder %v108_v29, 8.507059e+37 }
  0x37   :  { %v252_v25 = vpop.eup %251 }
  0x38   :  { %v100_v26 = vmul.f32 %v252_v25, %v98_v24  ;;  %vm105_vm4 = vweird.f32 %v252_v25 }
  0x39   :  { %vm106_vm5 = vmor %vm104_vm3, %vm105_vm4 }
  0x3a   :  { %v101_v28 = vsub.f32 1.0, %v100_v26 }
  0x3c   :  { %v102_v30 = vmul.f32 %v252_v25, %v101_v28 }
  0x3e   :  { %v103_v32 = vadd.f32 %v252_v25, %v102_v30 }
  0x40   :  { %v107_v33 = vsel %vm106_vm5, %v252_v25, %v103_v32 }
  0x41   :  { %v112_v34 = vsel %vm109_vm6, %v111_v31, %v107_v33 }
  0x42   :  { %v113_v35 = vmul.f32 %v250_v14, %v112_v34 }
  0x44   :  { %v119_v36 = vsel %vm117_vm2, %v113_v35, 0.0  ;;  %v127_v38 = vsel %vm81_vm1, %v113_v35, 0.0 }
  0x45   :  { %v120_v37 = vsel %vm81_vm1, %v119_v36, 0.0 }
  0x46   :  { %121 = vadd.xlane.f32.xlu0 %v120_v37 }
  0x4e   :  { %128 = vadd.xlane.f32.xlu0 %v127_v38 }
  0x85   :  { %v136_v40 = vpop.xlane.xlu1 %135 }
  0x86   :  { %v137_v41 = vadd.f32 %v136_v40, %v132_v39 }
  0x88   :  { %138 = vst.msk [vmem:[#allocation4] sm:$0x1f] %vm69_vm0, %v137_v41 }
  0xb9   :  { %v122_v43 = vpop.xlane.xlu0 %121 }
  0xba   :  { %v123_v44 = vadd.f32 %v122_v43, %v118_v42 }
  0xbc   :  { %125 = vst.msk [vmem:[#allocation2] sm:$0x1f] %vm69_vm0, %v123_v44 }
  0xc1   :  { %v129_v46 = vpop.xlane.xlu0 %128 }
  0xc2   :  { %v130_v47 = vadd.f32 %v129_v46, %v126_v45 }
  0xc4   :  { %131 = vst.msk [vmem:[#allocation3] sm:$0x1f] %vm69_vm0, %v130_v47 }
  0xc5 PF:  { %p243_p1 = scmp.ge.s32.totalorder %s378_s0, 8 }
  0xc7   :  { %141 = sbr.rel (%p243_p1) target bundleno = 391 (0x187), region = 25 }
  0xcc   :  { %v142_v48 = vld [vmem:[#allocation7] sm:$0x1f]  ;;  %vm151_vm7 = vcmask 61440   ;;  %v144_v54 = vlaneseq  ;;  %v148_v59 = vstv %s378_s0  ;;  %v143_v61 = vld [vmem:[%s380_s2] sm:$0x1]  ;;  %v286_v6 = vmov 0.0  }
  0xcd   :  { %v152_v49 = vsel %vm151_vm7, %v142_v48, -inf  ;;  %v205_v28 = vld [vmem:[#allocation4] sm:$0x1f]  ;;  %v191_v31 = vld [vmem:[#allocation2] sm:$0x1f] }
  0xce   :  { %v153_v50 = vrot.slane %v152_v49, 4  ;;  %v145_v57 = vand.u32 127, %v144_v54  ;;  %v188_v1 = vshrl.u32 %v144_v54, 7  ;;  %v199_v34 = vld [vmem:[#allocation3] sm:$0x1f] }
  0xd0   :  { %v154_v51 = vmax.f32 %v152_v49, %v153_v50  ;;  %vm349_vm8 = vcmp.lt.s32.totalorder %v145_v57, %v148_v59 }
  0xd1   :  { %v150_v63 = vsel %vm349_vm8, %v143_v61, 4294967295 }
  0xd2   :  { %v155_v52 = vrot.slane %v154_v51, 2  ;;  %v189_v2 = vperm.slane %v150_v63, 0 }
  0xd4   :  { %v156_v53 = vmax.f32 %v154_v51, %v155_v52  ;;  %vm190_vm9 = vcmp.eq.s32.totalorder %v188_v1, %v189_v2 }
  0xd5   :  { %v206_v7 = vsel %vm190_vm9, 1.0, %v286_v6 }
  0xd6   :  { %v157_v55 = vrot.slane %v156_v53, 1  ;;  %v207_v9 = vsel %vm151_vm7, %v206_v7, 0.0 }
  0xd7   :  { %208 = vadd.xlane.f32.xlu1 %v207_v9 }
  0xd8   :  { %v158_v56 = vmax.f32 %v156_v53, %v157_v55 }
  0xda   :  { %v159_v58 = vsub.f32 %v142_v48, %v158_v56 }
  0xdc   :  { %v160_v60 = vmul.f32 1.442695, %v159_v58 }
  0xde   :  { %253 = vpow2.f32 %v160_v60 }
  0xe4   :  { %v254_v0 = vpop.eup %253 }
  0xe5   :  { %v162_v3 = vsel %vm151_vm7, %v254_v0, 0.0 }
  0xe6   :  { %v163_v4 = vrot.slane %v162_v3, 4 }
  0xe8   :  { %v164_v5 = vadd.f32 %v163_v4, %v162_v3 }
  0xea   :  { %v165_v8 = vrot.slane %v164_v5, 2 }
  0xec   :  { %v166_v10 = vadd.f32 %v165_v8, %v164_v5 }
  0xee   :  { %v167_v11 = vrot.slane %v166_v10, 1 }
  0xf0   :  { %v168_v12 = vadd.f32 %v167_v11, %v166_v10 }
  0xf2   :  { %255 = vrcp.f32 %v168_v12  ;;  %v180_v15 = vand.u32 2147483648, %v168_v12  ;;  %vm174_vm10 = vweird.f32 %v168_v12  ;;  %v178_v17 = vand.u32 2147483647, %v168_v12 }
  0xf4   :  { %v181_v19 = vor.u32 1.1754944e-38, %v180_v15  ;;  %vm179_vm13 = vcmp.eq.f32.partialorder %v178_v17, 8.507059e+37 }
  0xf8   :  { %v256_v13 = vpop.eup %255 }
  0xf9   :  { %v170_v14 = vmul.f32 %v256_v13, %v168_v12  ;;  %vm175_vm11 = vweird.f32 %v256_v13 }
  0xfa   :  { %vm176_vm12 = vmor %vm174_vm10, %vm175_vm11 }
  0xfb   :  { %v171_v16 = vsub.f32 1.0, %v170_v14 }
  0xfd   :  { %v172_v18 = vmul.f32 %v256_v13, %v171_v16 }
  0xff   :  { %v173_v20 = vadd.f32 %v256_v13, %v172_v18 }
 0x101   :  { %v177_v21 = vsel %vm176_vm12, %v256_v13, %v173_v20 }
 0x102   :  { %v182_v22 = vsel %vm179_vm13, %v181_v19, %v177_v21 }
 0x103   :  { %v183_v23 = vmul.f32 %v254_v0, %v182_v22 }
 0x105   :  { %v186_v24 = vsel %vm349_vm8, %v183_v23, 0.0 }
 0x106   :  { %v192_v25 = vsel %vm190_vm9, %v186_v24, 0.0  ;;  %v200_v27 = vsel %vm151_vm7, %v186_v24, 0.0 }
 0x107   :  { %v193_v26 = vsel %vm151_vm7, %v192_v25, 0.0 }
 0x108   :  { %194 = vadd.xlane.f32.xlu0 %v193_v26 }
 0x110   :  { %201 = vadd.xlane.f32.xlu0 %v200_v27 }
 0x14a   :  { %v209_v29 = vpop.xlane.xlu1 %208 }
 0x14b   :  { %v210_v30 = vadd.f32 %v209_v29, %v205_v28 }
 0x14d   :  { %211 = vst.msk [vmem:[#allocation4] sm:$0x1f] %vm69_vm0, %v210_v30 }
 0x17b   :  { %v195_v32 = vpop.xlane.xlu0 %194 }
 0x17c   :  { %v196_v33 = vadd.f32 %v195_v32, %v191_v31 }
 0x17e   :  { %198 = vst.msk [vmem:[#allocation2] sm:$0x1f] %vm69_vm0, %v196_v33 }
 0x183   :  { %v202_v35 = vpop.xlane.xlu0 %201 }
 0x184   :  { %v203_v36 = vadd.f32 %v202_v35, %v199_v34 }
 0x186   :  { %204 = vst.msk [vmem:[#allocation3] sm:$0x1f] %vm69_vm0, %v203_v36 }
 0x187 PF:  { %v215_v37 = vld [vmem:[#allocation2] sm:$0x1f]  ;;  %v220_v39 = vld [vmem:[#allocation4] sm:$0x1f] }
 0x188   :  { %217 = vst.msk [vmem:[%s381_s3] sm:$0x1f] %vm69_vm0, %v215_v37 }
 0x189   :  { %221 = vst.msk [vmem:[%s383_s5] sm:$0x1f] %vm69_vm0, %v220_v39 }
 0x18d   :  { %v218_v38 = vld [vmem:[#allocation3] sm:$0x1f] }
 0x18e   :  { %219 = vst.msk [vmem:[%s382_s4] sm:$0x1f] %vm69_vm0, %v218_v38 }
 0x18f   :  { %234 = vsyncpa [#allocation8], 1 }

</bundles_post_ra>
